<compile_context>
chip_gen: v6e
topology: v6e:2x2x1
jax: 0.10.0
libtpu: 0.0.40
codegen_flags: <defaults>
</compile_context>

<pallas_src>
import jax
import jax.numpy as jnp
from jax.experimental import pallas as pl
from jax.experimental.pallas import tpu as pltpu


def _round_up(a, m):
    return (a + m - 1) // m * m


def income_net_kernel(x_ref, w1_ref, b1_ref, w2_ref, b2_ref, out_ref):
    # fc1: (TB, D)bf16 @ (D, 64)bf16 -> f32 accumulator on the MXU.
    h = jnp.dot(x_ref[...], w1_ref[...], preferred_element_type=jnp.float32)
    # Bias + ReLU epilogue in f32 (safe on v5e, free with the f32 accumulator).
    h = jnp.maximum(h + b1_ref[...], 0.0)
    # fc2: re-cast activations to bf16 for the MXU, accumulate in f32.
    y = jnp.dot(h.astype(jnp.bfloat16), w2_ref[...],
                preferred_element_type=jnp.float32)
    out_ref[...] = (y + b2_ref[...]).astype(out_ref.dtype)


def income_net_forward(x, w1, b1, w2, b2, *, tb=512):
    """x: (B, D) f32; w1: (D, 64); b1: (64,); w2: (64, C); b2: (C,)."""
    B, D = x.shape
    H = w1.shape[1]
    C = w2.shape[1]

    # Batch tile: multiple of 16 (bf16 sublane packing), clamped for small B.
    TB = _round_up(min(tb, _round_up(B, 16)), 16)
    B_pad = _round_up(B, TB)
    # Lane-dense output: pad the class dim up to a multiple of 128.
    C_pad = _round_up(max(C, 128), 128)

    # Stream x in bf16 (kernel is HBM-bound on x); pad batch for tiling.
    x_p = jnp.zeros((B_pad, D), jnp.bfloat16).at[:B].set(x.astype(jnp.bfloat16))
    w1_b = w1.astype(jnp.bfloat16)
    b1_row = b1.reshape(1, H).astype(jnp.float32)
    w2_b = jnp.zeros((H, C_pad), jnp.bfloat16).at[:, :C].set(
        w2.astype(jnp.bfloat16))
    b2_row = jnp.zeros((1, C_pad), jnp.float32).at[:, :C].set(
        b2.astype(jnp.float32))

    grid = (B_pad // TB,)

    out = pl.pallas_call(
        income_net_kernel,
        out_shape=jax.ShapeDtypeStruct((B_pad, C_pad), jnp.float32),
        grid=grid,
        in_specs=[
            # x streamed per batch tile (pipelined DMA behind compute).
            pl.BlockSpec((TB, D), lambda i: (i, 0)),
            # Weights / biases: constant index_map -> DMA'd once, VMEM-resident.
            pl.BlockSpec((D, H), lambda i: (0, 0)),
            pl.BlockSpec((1, H), lambda i: (0, 0)),
            pl.BlockSpec((H, C_pad), lambda i: (0, 0)),
            pl.BlockSpec((1, C_pad), lambda i: (0, 0)),
        ],
        out_specs=pl.BlockSpec((TB, C_pad), lambda i: (i, 0)),
        compiler_params=pltpu.CompilerParams(
            # Batch tiles are independent -> shard across v7x's 2 TensorCores.
            dimension_semantics=("parallel",)),
    )(x_p, w1_b, b1_row, w2_b, b2_row)

    # Strip batch padding and the lane-padded class columns.
    return out[:B, :C]


def init_params(key, input_size, num_classes, hidden=64):
    """Deterministic synthetic init (PyTorch-like uniform fan-in scaling)."""
    k1, k2, k3, k4 = jax.random.split(key, 4)
    bound1 = 1.0 / jnp.sqrt(input_size)
    bound2 = 1.0 / jnp.sqrt(hidden)
    # Stored already transposed relative to torch's (out, in) convention.
    w1 = jax.random.uniform(k1, (input_size, hidden), jnp.float32,
                            minval=-bound1, maxval=bound1)
    b1 = jax.random.uniform(k2, (hidden,), jnp.float32,
                            minval=-bound1, maxval=bound1)
    w2 = jax.random.uniform(k3, (hidden, num_classes), jnp.float32,
                            minval=-bound2, maxval=bound2)
    b2 = jax.random.uniform(k4, (num_classes,), jnp.float32,
                            minval=-bound2, maxval=bound2)
    return w1, b1, w2, b2


def _ref_forward(x, w1, b1, w2, b2):
    """Pure-JAX reference with the same bf16-in / f32-accumulate numerics."""
    h = jnp.dot(x.astype(jnp.bfloat16), w1.astype(jnp.bfloat16),
                preferred_element_type=jnp.float32) + b1
    h = jnp.maximum(h, 0.0)
    return jnp.dot(h.astype(jnp.bfloat16), w2.astype(jnp.bfloat16),
                   preferred_element_type=jnp.float32) + b2


if __name__ == "__main__":
    key = jax.random.PRNGKey(0)
    kx, kp = jax.random.split(key)

    batch = 8
    input_size = 32   # number of tabular income features
    num_classes = 2

    x = jax.random.normal(kx, (batch, input_size), jnp.float32)
    w1, b1, w2, b2 = init_params(kp, input_size, num_classes)

    # Small-batch run (single tile).
    out = jax.block_until_ready(income_net_forward(x, w1, b1, w2, b2))
    assert out.shape == (batch, num_classes)
    ref = _ref_forward(x, w1, b1, w2, b2)
    assert jnp.allclose(out, ref, atol=2e-2, rtol=2e-2)

    # Multi-tile run exercising batch tiling + padding (grid > 1).
    x2 = jax.random.normal(jax.random.PRNGKey(1), (300, input_size),
                           jnp.float32)
    out2 = jax.block_until_ready(
        income_net_forward(x2, w1, b1, w2, b2, tb=128))
    assert out2.shape == (300, num_classes)
    ref2 = _ref_forward(x2, w1, b1, w2, b2)
    assert jnp.allclose(out2, ref2, atol=2e-2, rtol=2e-2)

    print("KERNEL_OK")
</pallas_src>

<mosaic_0001>
module attributes {stable_mosaic.version = 11 : i64} {
  func.func @income_net_kernel(%arg0: i32, %arg1: memref<16x32xbf16, #tpu.memory_space<vmem>>, %arg2: memref<32x64xbf16, #tpu.memory_space<vmem>>, %arg3: memref<1x64xf32, #tpu.memory_space<vmem>>, %arg4: memref<64x128xbf16, #tpu.memory_space<vmem>>, %arg5: memref<1x128xf32, #tpu.memory_space<vmem>>, %arg6: memref<16x128xf32, #tpu.memory_space<vmem>>) attributes {dimension_semantics = [#tpu.dimension_semantics<parallel>], iteration_bounds = array<i64: 1>, scalar_prefetch = 0 : i64, scratch_operands = 0 : i64, tpu.core_type = #tpu.core_type<tc>, window_params = [{transform_indices = @transform_0, window_bounds = array<i64: 16, 32>}, {pipeline_mode = #tpu.pipeline_mode<synchronous>, transform_indices = @transform_1, window_bounds = array<i64: 32, 64>}, {pipeline_mode = #tpu.pipeline_mode<synchronous>, transform_indices = @transform_2, window_bounds = array<i64: 1, 64>}, {pipeline_mode = #tpu.pipeline_mode<synchronous>, transform_indices = @transform_3, window_bounds = array<i64: 64, 128>}, {pipeline_mode = #tpu.pipeline_mode<synchronous>, transform_indices = @transform_4, window_bounds = array<i64: 1, 128>}, {transform_indices = @transform_5, window_bounds = array<i64: 16, 128>}]} {
    %c0 = arith.constant 0 : index
    %c0_0 = arith.constant 0 : index
    %0 = vector.load %arg1[%c0, %c0_0] : memref<16x32xbf16, #tpu.memory_space<vmem>>, vector<16x32xbf16>
    %c0_1 = arith.constant 0 : index
    %c0_2 = arith.constant 0 : index
    %1 = vector.load %arg2[%c0_1, %c0_2] : memref<32x64xbf16, #tpu.memory_space<vmem>>, vector<32x64xbf16>
    %cst = arith.constant dense<0.000000e+00> : vector<16x64xf32>
    %2 = tpu.matmul %0, %1, %cst {dimension_numbers = #tpu.dot_dimension_numbers<[1], [0], [0], [1], [0, 0, 1, 1], [], []>} : vector<16x32xbf16>, vector<32x64xbf16>, vector<16x64xf32> -> vector<16x64xf32>
    %c0_3 = arith.constant 0 : index
    %c0_4 = arith.constant 0 : index
    %3 = vector.load %arg3[%c0_3, %c0_4] : memref<1x64xf32, #tpu.memory_space<vmem>>, vector<1x64xf32>
    %4 = vector.broadcast %3 : vector<1x64xf32> to vector<16x64xf32>
    %5 = arith.addf %2, %4 : vector<16x64xf32>
    %cst_5 = arith.constant 0.000000e+00 : f32
    %6 = vector.broadcast %cst_5 : f32 to vector<16x64xf32>
    %7 = arith.maximumf %5, %6 : vector<16x64xf32>
    %8 = arith.truncf %7 : vector<16x64xf32> to vector<16x64xbf16>
    %c0_6 = arith.constant 0 : index
    %c0_7 = arith.constant 0 : index
    %9 = vector.load %arg4[%c0_6, %c0_7] : memref<64x128xbf16, #tpu.memory_space<vmem>>, vector<64x128xbf16>
    %cst_8 = arith.constant dense<0.000000e+00> : vector<16x128xf32>
    %10 = tpu.matmul %8, %9, %cst_8 {dimension_numbers = #tpu.dot_dimension_numbers<[1], [0], [0], [1], [0, 0, 1, 1], [], []>} : vector<16x64xbf16>, vector<64x128xbf16>, vector<16x128xf32> -> vector<16x128xf32>
    %c0_9 = arith.constant 0 : index
    %c0_10 = arith.constant 0 : index
    %11 = vector.load %arg5[%c0_9, %c0_10] : memref<1x128xf32, #tpu.memory_space<vmem>>, vector<1x128xf32>
    %12 = vector.broadcast %11 : vector<1x128xf32> to vector<16x128xf32>
    %13 = arith.addf %10, %12 : vector<16x128xf32>
    %c0_11 = arith.constant 0 : index
    %c0_12 = arith.constant 0 : index
    %14 = vector.load %arg6[%c0_11, %c0_12] : memref<16x128xf32, #tpu.memory_space<vmem>>, vector<16x128xf32>
    tpu.vector_store %arg6[%c0_11, %c0_12], %13 {strides = array<i32>} : memref<16x128xf32, #tpu.memory_space<vmem>>, vector<16x128xf32>,
    return
  }
  func.func @transform_0(%arg0: i32) -> (i32, i32) {
    %c0_i32 = arith.constant 0 : i32
    %c0_i32_0 = arith.constant 0 : i32
    return %arg0, %c0_i32 : i32, i32
  }
  func.func @transform_1(%arg0: i32) -> (i32, i32) {
    %c0_i32 = arith.constant 0 : i32
    %c0_i32_0 = arith.constant 0 : i32
    %c0_i32_1 = arith.constant 0 : i32
    return %c0_i32, %c0_i32_0 : i32, i32
  }
  func.func @transform_2(%arg0: i32) -> (i32, i32) {
    %c0_i32 = arith.constant 0 : i32
    %c0_i32_0 = arith.constant 0 : i32
    %c0_i32_1 = arith.constant 0 : i32
    return %c0_i32, %c0_i32_0 : i32, i32
  }
  func.func @transform_3(%arg0: i32) -> (i32, i32) {
    %c0_i32 = arith.constant 0 : i32
    %c0_i32_0 = arith.constant 0 : i32
    %c0_i32_1 = arith.constant 0 : i32
    return %c0_i32, %c0_i32_0 : i32, i32
  }
  func.func @transform_4(%arg0: i32) -> (i32, i32) {
    %c0_i32 = arith.constant 0 : i32
    %c0_i32_0 = arith.constant 0 : i32
    %c0_i32_1 = arith.constant 0 : i32
    return %c0_i32, %c0_i32_0 : i32, i32
  }
  func.func @transform_5(%arg0: i32) -> (i32, i32) {
    %c0_i32 = arith.constant 0 : i32
    %c0_i32_0 = arith.constant 0 : i32
    return %arg0, %c0_i32 : i32, i32
  }
}

</mosaic_0001>

<bundles_post_ra>
// kernel: tpu_custom_call.1
= control target key start
LH: loop header
LB: loop body
LE: loop exit
PB: predicated region body
PF: predicated region fallthrough
CT: control target
= control target key end

     0   :  { %10 = vsyncpa [#allocation3], 0  ;;  %s445_s0 = inlined_call_operand.hbm [shape: bf16[16,32], index: 0, kind: input, shape index: {}]   ;;  %s446_s1 = inlined_call_operand.hbm [shape: bf16[32,64], index: 1, kind: input, shape index: {}]   ;;  %s447_s2 = inlined_call_operand.vmem [shape: f32[1,64], index: 2, kind: input, shape index: {}]   ;;  %s448_s3 = inlined_call_operand.hbm [shape: bf16[64,128], index: 3, kind: input, shape index: {}]   ;;  %s449_s4 = inlined_call_operand.vmem [shape: f32[1,128], index: 4, kind: input, shape index: {}]   ;;  %s450_s5 = inlined_call_operand.hbm [shape: f32[16,128], index: 5, kind: output, shape index: {}]  }
   0x1   :  { %11 = vsyncpa [#allocation6], 0 }
   0x2   :  { %12 = vsyncpa [#allocation4], 0  ;;  %s387_s18 = smov [#allocation5]   ;;  %s388_s20 = smov [#allocation2]  }
   0x3   :  { %s30_s19 = sshll.u32 %s387_s18, 4  ;;  %s18_s21 = sshll.u32 %s388_s20, 4  ;;  %s31_s19 = int_to_ptr.vmem [resolvable:$true] %s30_s19  ;;  %s19_s21 = int_to_ptr.vmem [resolvable:$true] %s18_s21 }
   0x4   :  { %s309_s22 = scalar_lea.vmem %s31_s19, 256  ;;  %p314_p1 = scmp.lt.s32.totalorder %s31_s19, %s31_s19 }
   0x5   :  { %p310_p0 = scmp.ne.s32.totalorder %s31_s19, %s309_s22  ;;  %p315_p2 = scmp.lt.s32.totalorder %s309_s22, %s309_s22 }
   0x7   :  { %p316_p3 = por %p315_p2, %p314_p1 }
   0x9   :  { %p317_p4 = pnand %p316_p3, %p310_p0 }
   0xb   :  { %320 = shalt.err (!%p317_p4)
}
   0xc   :  { %s389_s23 = smov 64   ;;  %s390_s24 = smov 4  }
   0xd   :  { %36 = dma.hbm_to_vmem [thread:$0]  %s446_s1, 256, %s31_s19, [#allocation6], %s389_s23, %s389_s23, %s390_s24  }
   0xe   :  { %s329_s27 = scalar_lea.vmem %s19_s21, 128  ;;  %p334_p6 = scmp.lt.s32.totalorder %s19_s21, %s19_s21 }
   0xf   :  { %p330_p5 = scmp.ne.s32.totalorder %s19_s21, %s329_s27  ;;  %p335_p7 = scmp.lt.s32.totalorder %s329_s27, %s329_s27 }
  0x11   :  { %p336_p8 = por %p335_p7, %p334_p6 }
  0x13   :  { %p337_p9 = pnand %p336_p8, %p330_p5 }
  0x15   :  { %340 = shalt.err (!%p337_p9)
}
  0x16   :  { %24 = dma.hbm_to_vmem [thread:$0]  %s445_s0, 128, %s19_s21, [#allocation3], %s389_s23, %s389_s23, %s390_s24  }
  0x17   :  { %s391_s30 = smov [#allocation7]  }
  0x18   :  { %s44_s6 = sshll.u32 %s391_s30, 4  ;;  %s45_s6 = int_to_ptr.vmem [resolvable:$true] %s44_s6 }
  0x19   :  { %s349_s7 = scalar_lea.vmem %s45_s6, 512  ;;  %p354_p11 = scmp.lt.s32.totalorder %s45_s6, %s45_s6 }
  0x1a   :  { %p350_p10 = scmp.ne.s32.totalorder %s45_s6, %s349_s7  ;;  %p355_p12 = scmp.lt.s32.totalorder %s349_s7, %s349_s7 }
  0x1c   :  { %p356_p13 = por %p355_p12, %p354_p11 }
  0x1e   :  { %p357_p0 = pnand %p356_p13, %p350_p10 }
  0x20   :  { %360 = shalt.err (!%p357_p0)
}
  0x21   :  { %50 = dma.hbm_to_vmem [thread:$0]  %s448_s3, 512, %s45_s6, [#allocation6], %s389_s23, %s389_s23, %s390_s24  }
  0x22   :  { %381 = dma.done.wait [#allocation3], 128  }
  0x23   :  { %382 = vsyncadd [#allocation3], 4294967168 }
  0x24   :  { %383 = dma.done.wait [#allocation6], 768  }
  0x25   :  { %384 = vsyncadd [#allocation6], 4294966528  ;;  %v392_v0 = vmov 0.0   ;;  %vm393_vm0 = vmmov 0   ;;  %v294_v1 = vld [vmem:[#allocation5 + $0x8] sm:$0xff]   ;;  %v295_v2 = vld [vmem:[#allocation5] sm:$0xff]  }
  0x26   :  { %264 = vmatprep.subr.bf16.mxu0 %v392_v0  ;;  %268 = vmatprep.mubr.msk.bf16.mxu0 %vm393_vm0, %v392_v0  ;;  %v297_v3 = vld [vmem:[#allocation7 + $0x18] sm:$0xff]   ;;  %v296_v4 = vld [vmem:[#allocation2] sm:$0xff]   ;;  %vm93_vm1 = vcmask 261120   ;;  %v298_v5 = vld [vmem:[#allocation7 + $0x10] sm:$0xff]   ;;  %vm180_vm2 = vcmask 523264   ;;  %s394_s11 = smov [#allocation8]  }
  0x27   :  { %272 = vmatprep.subr.bf16.mxu1 %v392_v0  ;;  %280 = vmatprep.mubr.msk.bf16.mxu1 %vm393_vm0, %v392_v0  ;;  %v299_v6 = vld [vmem:[#allocation7 + $0x8] sm:$0xff]   ;;  %v300_v7 = vld [vmem:[#allocation7] sm:$0xff]   ;;  %s232_s12 = sshll.u32 %s394_s11, 4  ;;  %s233_s12 = int_to_ptr.vmem [resolvable:$true] %s232_s12 }
  0x28   :  { %265 = vmatpush3.bf16.msra.mxu0 %v294_v1  ;;  %273 = vmatpush3.bf16.msra.mxu1 %v297_v3  ;;  %v245_v8 = vld [vmem:[%s447_s2] ss:$0 sm:$0xff]  ;;  %s361_s2 = scalar_lea.vmem %s233_s12, 256  ;;  %p366_p2 = scmp.lt.s32.totalorder %s233_s12, %s233_s12 }
  0x29   :  { %266 = vmatprep.subr.bf16.mxu0 %v392_v0  ;;  %274 = vmatprep.subr.bf16.mxu1 %v392_v0  ;;  %v250_v18 = vld [vmem:[%s449_s4] ss:$0 sm:$0xff]  ;;  %p362_p1 = scmp.ne.s32.totalorder %s233_s12, %s361_s2  ;;  %p367_p3 = scmp.lt.s32.totalorder %s361_s2, %s361_s2 }
  0x2b   :  { %p368_p4 = por %p367_p3, %p366_p2 }
  0x2c   :  { %267 = vmatpush3.bf16.msra.mxu0 %v295_v2  ;;  %275 = vmatpush3.bf16.msra.mxu1 %v298_v5 }
  0x2d   :  { %276 = vmatprep.subr.bf16.mxu1 %v392_v0  ;;  %p369_p5 = pnand %p368_p4, %p362_p1 }
  0x2f   :  { %269 = vmatmul.mubr.msk.bf16.vlgmr.msra.gmra.mxu0 %vm93_vm1, %v296_v4 }
  0x30   :  { %277 = vmatpush3.bf16.msra.mxu1 %v299_v6 }
  0x31   :  { %278 = vmatprep.subr.bf16.mxu1 %v392_v0 }
  0x34   :  { %279 = vmatpush3.bf16.msra.mxu1 %v300_v7 }
  0xef   :  { %v131_v9 = vpop.f32.mrf.mxu0 }
  0xf0   :  { %v132_v11 = vadd.f32 %v245_v8, %v131_v9 }
  0xf1   :  { %v270_v10 = vpop.f32.mrf.mxu0 }
  0xf2   :  { %v138_v15 = vmax.f32 %v132_v11, 0.0 }
  0xf3   :  { %v134_v12 = vpop.f32.mrf.mxu0 }
  0xf4   :  { %v135_v13 = vadd.f32 %v245_v8, %v134_v12 }
  0xf5   :  { %v271_v14 = vpop.f32.mrf.mxu0 }
  0xf6   :  { %v139_v16 = vmax.f32 %v135_v13, 0.0 }
  0xf8   :  { %v140_v17 = vpack.c.bf16 %v139_v16, %v138_v15 }
  0xfa   :  { %281 = vmatmul.mubr.msk.bf16.vlgmr.msra.gmra.mxu1 %vm180_vm2, %v140_v17 }
 0x1ba   :  { %v218_v19 = vpop.f32.mrf.mxu1 }
 0x1bb   :  { %v219_v20 = vadd.f32 %v250_v18, %v218_v19 }
 0x1bc   :  { %v282_v21 = vpop.f32.mrf.mxu1 }
 0x1bd   :  { %225 = vst [vmem:[#allocation8] sm:$0xff] %v219_v20 }
 0x1be   :  { %v221_v22 = vpop.f32.mrf.mxu1 }
 0x1bf   :  { %v222_v23 = vadd.f32 %v250_v18, %v221_v22 }
 0x1c0   :  { %v283_v24 = vpop.f32.mrf.mxu1 }
 0x1c1   :  { %226 = vst [vmem:[#allocation8 + $0x8] sm:$0xff] %v222_v23 }
 0x1c2   :  { %372 = shalt.err (!%p369_p5)
}
 0x1c3   :  { %s395_s13 = smov 128   ;;  %s396_s4 = smov 8  }
 0x1c4   :  { %238 = dma.vmem_to_hbm [thread:$0]  %s233_s12, 256, %s450_s5, [#allocation4], %s395_s13, %s395_s13, %s396_s4  }
 0x1c5   :  { %385 = dma.done.wait [#allocation4], 256  }
 0x1c6   :  { %386 = vsyncadd [#allocation4], 4294967040 }
 0x1c7   :  { %242 = vsyncpa [#allocation3], 1 }
 0x1c8   :  { %243 = vsyncpa [#allocation6], 1 }
 0x1c9   :  { %244 = vsyncpa [#allocation4], 1 }

</bundles_post_ra>
